<compile_context>
chip_gen: v6e
topology: v6e:2x2x1
jax: 0.10.0
libtpu: 0.0.40
codegen_flags: <defaults>
</compile_context>

<pallas_src>
import jax
import jax.numpy as jnp
from jax.experimental import pallas as pl
from jax.experimental.pallas import tpu as pltpu


def value_net_kernel(s_ref, w1_ref, b1_ref, w2_ref, b2_ref, w3_ref, b3_ref,
                     out_ref):
    # s_ref  : (state_dim, TM)   -- batch along lanes
    # w1_ref : (hidden, state_dim)   b1_ref : (hidden, 1)
    # w2_ref : (hidden, hidden)      b2_ref : (hidden, 1)
    # w3_ref : (hidden, 1)           b3_ref : (1, 1)
    # out_ref: (1, TM)           -- lane-dense row of values
    s = s_ref[...]

    # Layer 1 (MXU): (hidden, state_dim) @ (state_dim, TM) -> (hidden, TM)
    h1 = jnp.dot(w1_ref[...], s, preferred_element_type=jnp.float32) + b1_ref[...]
    h1 = jnp.maximum(h1, 0.0)

    # Layer 2 (MXU): (hidden, hidden) @ (hidden, TM) -> (hidden, TM)
    h2 = jnp.dot(w2_ref[...], h1, preferred_element_type=jnp.float32) + b2_ref[...]
    h2 = jnp.maximum(h2, 0.0)

    # Layer 3 (scalar value head): keep the N=1 contraction OFF the MXU.
    # VPU multiply (lane-broadcast of the w3 column) + cross-sublane reduce;
    # the result is already lane-dense.
    v = jnp.sum(h2 * w3_ref[...], axis=0, keepdims=True) + b3_ref[...]

    out_ref[...] = v.astype(out_ref.dtype)


def value_network_forward(state, params, *, tm=256):
    """state: (B, state_dim) float32; params in PyTorch (out_f, in_f) orientation.

    Returns (B, 1) float32, matching ValueNetwork.forward.
    """
    B, state_dim = state.shape
    hidden = params["w1"].shape[0]

    # Pad the batch to a multiple of TM: no partial blocks, every store is a
    # full lane-dense row; padded lanes are computed and sliced off.
    num_tiles = pl.cdiv(B, tm)
    b_pad = num_tiles * tm

    # Layout plumbing in the wrapper: batch -> lanes, features -> sublanes.
    s_t = jnp.pad(state.T, ((0, 0), (0, b_pad - B)))      # (state_dim, B_pad)
    w1 = params["w1"]                                      # (hidden, state_dim)
    b1 = params["b1"].reshape(hidden, 1)
    w2 = params["w2"]                                      # (hidden, hidden)
    b2 = params["b2"].reshape(hidden, 1)
    w3 = params["w3"].reshape(hidden, 1)                   # column vector
    b3 = params["b3"].reshape(1, 1)

    # NOTE: on v6e/v7x, casting s_t / w1 / w2 to bf16 here (keeping the f32
    # accumulation inside the kernel) halves DMA bytes and vreg footprint;
    # kept f32 for parity with the f32 reference below.

    out_row = pl.pallas_call(
        value_net_kernel,
        out_shape=jax.ShapeDtypeStruct((1, b_pad), jnp.float32),
        grid_spec=pltpu.PrefetchScalarGridSpec(
            num_scalar_prefetch=0,
            grid=(num_tiles,),
            in_specs=[
                # Only the state tile streams (default double-buffering).
                pl.BlockSpec((state_dim, tm), lambda i: (0, i)),
                # Weights / biases: constant index maps -> VMEM-resident.
                pl.BlockSpec((hidden, state_dim), lambda i: (0, 0)),
                pl.BlockSpec((hidden, 1), lambda i: (0, 0)),
                pl.BlockSpec((hidden, hidden), lambda i: (0, 0)),
                pl.BlockSpec((hidden, 1), lambda i: (0, 0)),
                pl.BlockSpec((hidden, 1), lambda i: (0, 0)),
                pl.BlockSpec((1, 1), lambda i: (0, 0)),
            ],
            out_specs=pl.BlockSpec((1, tm), lambda i: (0, i)),
        ),
        compiler_params=pltpu.CompilerParams(
            # Independent batch tiles: shard across v7x's 2 TensorCores.
            dimension_semantics=("parallel",),
        ),
    )(s_t, w1, b1, w2, b2, w3, b3)

    return out_row[0, :B].reshape(B, 1)


def init_value_network_params(key, state_dim, hidden_dim, init_w=0.003):
    """Mirrors the PyTorch module's init, weights in (out_features, in_features)."""
    k1, k2, k3, k4, k5, k6 = jax.random.split(key, 6)

    bound1 = 1.0 / (state_dim ** 0.5)
    w1 = jax.random.uniform(k1, (hidden_dim, state_dim), jnp.float32,
                            minval=-bound1, maxval=bound1)
    b1 = jax.random.uniform(k2, (hidden_dim,), jnp.float32,
                            minval=-bound1, maxval=bound1)

    bound2 = 1.0 / (hidden_dim ** 0.5)
    w2 = jax.random.uniform(k3, (hidden_dim, hidden_dim), jnp.float32,
                            minval=-bound2, maxval=bound2)
    b2 = jax.random.uniform(k4, (hidden_dim,), jnp.float32,
                            minval=-bound2, maxval=bound2)

    w3 = jax.random.uniform(k5, (1, hidden_dim), jnp.float32,
                            minval=-init_w, maxval=init_w)
    b3 = jax.random.uniform(k6, (1,), jnp.float32,
                            minval=-init_w, maxval=init_w)

    return {"w1": w1, "b1": b1, "w2": w2, "b2": b2, "w3": w3, "b3": b3}


def value_network_ref(state, params):
    """Pure-JAX reference (PyTorch semantics: y = x @ W.T + b)."""
    x = jnp.maximum(state @ params["w1"].T + params["b1"], 0.0)
    x = jnp.maximum(x @ params["w2"].T + params["b2"], 0.0)
    return x @ params["w3"].T + params["b3"]


if __name__ == "__main__":
    batch = 2
    state_dim = 8
    hidden_dim = 32

    key = jax.random.PRNGKey(0)
    k_state, k_params = jax.random.split(key)

    state = jax.random.normal(k_state, (batch, state_dim), dtype=jnp.float32)
    params = init_value_network_params(k_params, state_dim, hidden_dim)

    out = value_network_forward(state, params)
    out = jax.block_until_ready(out)

    ref = value_network_ref(state, params)
    assert out.shape == (batch, 1), out.shape
    assert jnp.allclose(out, ref, atol=1e-5, rtol=1e-5), (out, ref)

    print("KERNEL_OK")
</pallas_src>

<mosaic_0001>
module attributes {stable_mosaic.version = 11 : i64} {
  func.func @value_net_kernel(%arg0: i32, %arg1: memref<8x256xf32, #tpu.memory_space<vmem>>, %arg2: memref<32x8xf32, #tpu.memory_space<vmem>>, %arg3: memref<32x1xf32, #tpu.memory_space<vmem>>, %arg4: memref<32x32xf32, #tpu.memory_space<vmem>>, %arg5: memref<32x1xf32, #tpu.memory_space<vmem>>, %arg6: memref<32x1xf32, #tpu.memory_space<vmem>>, %arg7: memref<1x1xf32, #tpu.memory_space<vmem>>, %arg8: memref<1x256xf32, #tpu.memory_space<vmem>>) attributes {dimension_semantics = [#tpu.dimension_semantics<parallel>], iteration_bounds = array<i64: 1>, scalar_prefetch = 0 : i64, scratch_operands = 0 : i64, tpu.core_type = #tpu.core_type<tc>, window_params = [{transform_indices = @transform_0, window_bounds = array<i64: 8, 256>}, {pipeline_mode = #tpu.pipeline_mode<synchronous>, transform_indices = @transform_1, window_bounds = array<i64: 32, 8>}, {pipeline_mode = #tpu.pipeline_mode<synchronous>, transform_indices = @transform_2, window_bounds = array<i64: 32, 1>}, {pipeline_mode = #tpu.pipeline_mode<synchronous>, transform_indices = @transform_3, window_bounds = array<i64: 32, 32>}, {pipeline_mode = #tpu.pipeline_mode<synchronous>, transform_indices = @transform_4, window_bounds = array<i64: 32, 1>}, {pipeline_mode = #tpu.pipeline_mode<synchronous>, transform_indices = @transform_5, window_bounds = array<i64: 32, 1>}, {pipeline_mode = #tpu.pipeline_mode<synchronous>, transform_indices = @transform_6, window_bounds = array<i64: 1, 1>}, {transform_indices = @transform_7, window_bounds = array<i64: 1, 256>}]} {
    %c0 = arith.constant 0 : index
    %c0_0 = arith.constant 0 : index
    %0 = vector.load %arg1[%c0, %c0_0] : memref<8x256xf32, #tpu.memory_space<vmem>>, vector<8x256xf32>
    %c0_1 = arith.constant 0 : index
    %c0_2 = arith.constant 0 : index
    %1 = vector.load %arg2[%c0_1, %c0_2] : memref<32x8xf32, #tpu.memory_space<vmem>>, vector<32x8xf32>
    %cst = arith.constant dense<0.000000e+00> : vector<32x256xf32>
    %2 = tpu.matmul %1, %0, %cst {dimension_numbers = #tpu.dot_dimension_numbers<[1], [0], [0], [1], [0, 0, 1, 1], [], []>} : vector<32x8xf32>, vector<8x256xf32>, vector<32x256xf32> -> vector<32x256xf32>
    %c0_3 = arith.constant 0 : index
    %c0_4 = arith.constant 0 : index
    %3 = vector.load %arg3[%c0_3, %c0_4] : memref<32x1xf32, #tpu.memory_space<vmem>>, vector<32x1xf32>
    %4 = vector.broadcast %3 : vector<32x1xf32> to vector<32x256xf32>
    %5 = arith.addf %2, %4 : vector<32x256xf32>
    %cst_5 = arith.constant 0.000000e+00 : f32
    %6 = vector.broadcast %cst_5 : f32 to vector<32x256xf32>
    %7 = arith.maximumf %5, %6 : vector<32x256xf32>
    %c0_6 = arith.constant 0 : index
    %c0_7 = arith.constant 0 : index
    %8 = vector.load %arg4[%c0_6, %c0_7] : memref<32x32xf32, #tpu.memory_space<vmem>>, vector<32x32xf32>
    %cst_8 = arith.constant dense<0.000000e+00> : vector<32x256xf32>
    %9 = tpu.matmul %8, %7, %cst_8 {dimension_numbers = #tpu.dot_dimension_numbers<[1], [0], [0], [1], [0, 0, 1, 1], [], []>} : vector<32x32xf32>, vector<32x256xf32>, vector<32x256xf32> -> vector<32x256xf32>
    %c0_9 = arith.constant 0 : index
    %c0_10 = arith.constant 0 : index
    %10 = vector.load %arg5[%c0_9, %c0_10] : memref<32x1xf32, #tpu.memory_space<vmem>>, vector<32x1xf32>
    %11 = vector.broadcast %10 : vector<32x1xf32> to vector<32x256xf32>
    %12 = arith.addf %9, %11 : vector<32x256xf32>
    %cst_11 = arith.constant 0.000000e+00 : f32
    %13 = vector.broadcast %cst_11 : f32 to vector<32x256xf32>
    %14 = arith.maximumf %12, %13 : vector<32x256xf32>
    %c0_12 = arith.constant 0 : index
    %c0_13 = arith.constant 0 : index
    %15 = vector.load %arg6[%c0_12, %c0_13] : memref<32x1xf32, #tpu.memory_space<vmem>>, vector<32x1xf32>
    %16 = vector.broadcast %15 : vector<32x1xf32> to vector<32x256xf32>
    %17 = arith.mulf %14, %16 : vector<32x256xf32>
    %cst_14 = arith.constant dense<0.000000e+00> : vector<256xf32>
    %18 = vector.multi_reduction <add>, %17, %cst_14 [0] : vector<32x256xf32> to vector<256xf32>
    %19 = vector.shape_cast %18 : vector<256xf32> to vector<1x256xf32>
    %c0_15 = arith.constant 0 : index
    %c0_16 = arith.constant 0 : index
    %20 = vector.load %arg7[%c0_15, %c0_16] : memref<1x1xf32, #tpu.memory_space<vmem>>, vector<1x1xf32>
    %21 = vector.broadcast %20 : vector<1x1xf32> to vector<1x256xf32>
    %22 = arith.addf %19, %21 : vector<1x256xf32>
    %c0_17 = arith.constant 0 : index
    %c0_18 = arith.constant 0 : index
    %23 = vector.load %arg8[%c0_17, %c0_18] : memref<1x256xf32, #tpu.memory_space<vmem>>, vector<1x256xf32>
    tpu.vector_store %arg8[%c0_17, %c0_18], %22 {strides = array<i32>} : memref<1x256xf32, #tpu.memory_space<vmem>>, vector<1x256xf32>,
    return
  }
  func.func @transform_0(%arg0: i32) -> (i32, i32) {
    %c0_i32 = arith.constant 0 : i32
    %c0_i32_0 = arith.constant 0 : i32
    return %c0_i32, %arg0 : i32, i32
  }
  func.func @transform_1(%arg0: i32) -> (i32, i32) {
    %c0_i32 = arith.constant 0 : i32
    %c0_i32_0 = arith.constant 0 : i32
    %c0_i32_1 = arith.constant 0 : i32
    return %c0_i32, %c0_i32_0 : i32, i32
  }
  func.func @transform_2(%arg0: i32) -> (i32, i32) {
    %c0_i32 = arith.constant 0 : i32
    %c0_i32_0 = arith.constant 0 : i32
    %c0_i32_1 = arith.constant 0 : i32
    return %c0_i32, %c0_i32_0 : i32, i32
  }
  func.func @transform_3(%arg0: i32) -> (i32, i32) {
    %c0_i32 = arith.constant 0 : i32
    %c0_i32_0 = arith.constant 0 : i32
    %c0_i32_1 = arith.constant 0 : i32
    return %c0_i32, %c0_i32_0 : i32, i32
  }
  func.func @transform_4(%arg0: i32) -> (i32, i32) {
    %c0_i32 = arith.constant 0 : i32
    %c0_i32_0 = arith.constant 0 : i32
    %c0_i32_1 = arith.constant 0 : i32
    return %c0_i32, %c0_i32_0 : i32, i32
  }
  func.func @transform_5(%arg0: i32) -> (i32, i32) {
    %c0_i32 = arith.constant 0 : i32
    %c0_i32_0 = arith.constant 0 : i32
    %c0_i32_1 = arith.constant 0 : i32
    return %c0_i32, %c0_i32_0 : i32, i32
  }
  func.func @transform_6(%arg0: i32) -> (i32, i32) {
    %c0_i32 = arith.constant 0 : i32
    %c0_i32_0 = arith.constant 0 : i32
    %c0_i32_1 = arith.constant 0 : i32
    return %c0_i32, %c0_i32_0 : i32, i32
  }
  func.func @transform_7(%arg0: i32) -> (i32, i32) {
    %c0_i32 = arith.constant 0 : i32
    %c0_i32_0 = arith.constant 0 : i32
    return %c0_i32, %arg0 : i32, i32
  }
}

</mosaic_0001>

<bundles_post_ra>
// kernel: tpu_custom_call.1
= control target key start
LH: loop header
LB: loop body
LE: loop exit
PB: predicated region body
PF: predicated region fallthrough
CT: control target
= control target key end

     0   :  { %s570_s0 = inlined_call_operand.vmem [shape: f32[8,256], index: 0, kind: input, shape index: {}]   ;;  %s571_s1 = inlined_call_operand.vmem [shape: f32[32,8], index: 1, kind: input, shape index: {}]   ;;  %s572_s2 = inlined_call_operand.vmem [shape: f32[32,1], index: 2, kind: input, shape index: {}]   ;;  %s573_s3 = inlined_call_operand.vmem [shape: f32[32,32], index: 3, kind: input, shape index: {}]   ;;  %s574_s4 = inlined_call_operand.vmem [shape: f32[32,1], index: 4, kind: input, shape index: {}]   ;;  %s575_s5 = inlined_call_operand.vmem [shape: f32[32,1], index: 5, kind: input, shape index: {}]   ;;  %s576_s6 = inlined_call_operand.<no memory space> [shape: f32[1,1], index: 6, kind: input, shape index: {}]   ;;  %s577_s7 = inlined_call_operand.hbm [shape: f32[1,256], index: 7, kind: output, shape index: {}]  }
   0x1   :  { %v12_v0 = vstv %s576_s6 }
   0x2   :  { %13 = vst [vmem:[#allocation2] sm:$0x1] %v12_v0 }
   0x3   :  { %v30_v1 = vld [vmem:[%s570_s0 + $0x8] sm:$0xff]  ;;  %v29_v2 = vld [vmem:[%s570_s0] sm:$0xff]  ;;  %vm59_vm0 = vcmask 64512   ;;  %v442_v4 = vmov 0.0   ;;  %v443_v5 = vmov 0   ;;  %v38_v6 = vld [vmem:[%s572_s2 + $0x18] sm:$0xff] }
   0x4   :  { %v31_v3 = vld [vmem:[%s571_s1] sm:$0xff]  ;;  %102 = vmatprep.subr.mxu0 %v30_v1  ;;  %136 = vmatprep.mubr.f32.mxu0 %v442_v4  ;;  %v36_v7 = vld [vmem:[%s572_s2 + $0x8] sm:$0xff]  ;;  %v37_v9 = vld [vmem:[%s572_s2 + $0x10] sm:$0xff] }
   0x5   :  { %103 = vmatpush1.msra.mxu0 %v29_v2  ;;  %418 = vset.pattern.permute.xlu0 %v443_v5  ;;  %v32_v8 = vld [vmem:[%s571_s1 + $0x8] sm:$0xff]  ;;  %v35_v10 = vld [vmem:[%s572_s2] sm:$0xff] }
   0x6   :  { %406 = vmatmul.mubr.msk.f32.vlgmr.msra.gmra.mxu0 %vm59_vm0, %v31_v3  ;;  %56 = vperm.xlu0 %418, %v38_v6  }
   0x7   :  { %142 = vmatprep.mubr.f32.mxu0 %v442_v4  ;;  %419 = vset.pattern.permute.xlu1 %v443_v5 }
   0x8   :  { %46 = vperm.xlu1 %419, %v36_v7   ;;  %274 = vmatprep.mubr.f32.mxu1 %v442_v4 }
   0x9   :  { %14 = vsyncpa [#allocation4], 0  ;;  %v33_v11 = vld [vmem:[%s571_s1 + $0x10] sm:$0xff]  ;;  %v173_v12 = vld [vmem:[%s574_s4] sm:$0xff]  ;;  %vm197_vm1 = vcmask 261120  }
   0xa   :  { %407 = vmatmul.mubr.msk.f32.gmra.mxu0 %vm59_vm0, %v32_v8  ;;  %51 = vperm.xlu0 %418, %v37_v9   ;;  %v174_v13 = vld [vmem:[%s574_s4 + $0x8] sm:$0xff]  ;;  %v34_v14 = vld [vmem:[%s571_s1 + $0x18] sm:$0xff]  ;;  %v175_v15 = vld [vmem:[%s574_s4 + $0x10] sm:$0xff] }
   0xb   :  { %148 = vmatprep.mubr.f32.mxu0 %v442_v4  ;;  %v176_v16 = vld [vmem:[%s574_s4 + $0x18] sm:$0xff]  ;;  %v307_v17 = vld [vmem:[%s575_s5] sm:$0xff]  ;;  %v308_v18 = vld [vmem:[%s575_s5 + $0x8] sm:$0xff] }
   0xc   :  { %41 = vperm.xlu1 %419, %v35_v10   ;;  %v309_v19 = vld [vmem:[%s575_s5 + $0x10] sm:$0xff]  ;;  %v310_v20 = vld [vmem:[%s575_s5 + $0x18] sm:$0xff]  ;;  %v357_v21 = vld [vmem:[#allocation2] sm:$0x1] }
   0xd   :  { %v169_v50 = vld [vmem:[%s573_s3] sm:$0xff]  ;;  %v170_v51 = vld [vmem:[%s573_s3 + $0x8] sm:$0xff]  ;;  %v171_v52 = vld [vmem:[%s573_s3 + $0x10] sm:$0xff] }
   0xe   :  { %408 = vmatmul.mubr.msk.f32.gmra.mxu0 %vm59_vm0, %v33_v11  ;;  %179 = vperm.xlu0 %418, %v173_v12   ;;  %v172_v53 = vld [vmem:[%s573_s3 + $0x18] sm:$0xff]  ;;  %s445_s3 = smov [#allocation3]  }
   0xf   :  { %154 = vmatprep.mubr.f32.mxu0 %v442_v4  ;;  %s398_s16 = sshll.u32 %s445_s3, 4  ;;  %s399_s16 = int_to_ptr.vmem [resolvable:$true] %s398_s16 }
  0x10   :  { %184 = vperm.xlu1 %419, %v174_v13   ;;  %s420_s17 = scalar_lea.vmem %s399_s16, 32  ;;  %p425_p1 = scmp.lt.s32.totalorder %s399_s16, %s399_s16 }
  0x11   :  { %p421_p0 = scmp.ne.s32.totalorder %s399_s16, %s420_s17  ;;  %p426_p2 = scmp.lt.s32.totalorder %s420_s17, %s420_s17 }
  0x12   :  { %409 = vmatmul.mubr.msk.f32.gmra.mxu0 %vm59_vm0, %v34_v14  ;;  %189 = vperm.xlu0 %418, %v175_v15  }
  0x13   :  { %p427_p3 = por %p426_p2, %p425_p1 }
  0x14   :  { %194 = vperm.xlu1 %419, %v176_v16  }
  0x15   :  { %p428_p4 = pnand %p427_p3, %p421_p0 }
  0x16   :  { %313 = vperm.xlu0 %418, %v307_v17  }
  0x18   :  { %318 = vperm.xlu1 %419, %v308_v18  }
  0x1a   :  { %323 = vperm.xlu0 %418, %v309_v19  }
  0x1c   :  { %328 = vperm.xlu1 %419, %v310_v20  }
  0x1e   :  { %360 = vperm.xlu0 %418, %v357_v21  }
  0x81   :  { %v57_v26 = vpop.permute.xlu0 %56 }
  0x83   :  { %v47_v29 = vpop.permute.xlu1 %46 }
  0x85   :  { %v52_v31 = vpop.permute.xlu0 %51 }
  0x87   :  { %v42_v37 = vpop.permute.xlu1 %41 }
  0x89   :  { %v180_v54 = vpop.permute.xlu0 %179 }
  0x8b   :  { %v185_v55 = vpop.permute.xlu1 %184 }
  0x8d   :  { %v190_v56 = vpop.permute.xlu0 %189 }
  0x8f   :  { %v195_v59 = vpop.permute.xlu1 %194 }
  0x91   :  { %v314_v63 = vpop.permute.xlu0 %313 }
  0x93   :  { %v319_v8 = vpop.permute.xlu1 %318 }
  0x95   :  { %v324_v14 = vpop.permute.xlu0 %323 }
  0xc6   :  { %v138_v22 = vpop.f32.mrf.mxu0 }
  0xc7   :  { %v139_v44 = vadd.f32 %v138_v22, %v42_v37 }
  0xc8   :  { %v140_v23 = vpop.f32.mrf.mxu0 }
  0xc9   :  { %v141_v42 = vadd.f32 %v140_v23, %v42_v37  ;;  %v161_v49 = vmax.f32 %v139_v44, 0.0 }
  0xca   :  { %v144_v24 = vpop.f32.mrf.mxu0 }
  0xcb   :  { %v145_v40 = vadd.f32 %v144_v24, %v47_v29  ;;  %v162_v48 = vmax.f32 %v141_v42, 0.0 }
  0xcc   :  { %v146_v25 = vpop.f32.mrf.mxu0 }
  0xcd   :  { %v147_v38 = vadd.f32 %v146_v25, %v47_v29  ;;  %v163_v47 = vmax.f32 %v145_v40, 0.0 }
  0xce   :  { %v150_v27 = vpop.f32.mrf.mxu0 }
  0xcf   :  { %v151_v36 = vadd.f32 %v150_v27, %v52_v31  ;;  %v164_v46 = vmax.f32 %v147_v38, 0.0  ;;  %v329_v27 = vpop.permute.xlu1 %328 }
  0xd0   :  { %v152_v28 = vpop.f32.mrf.mxu0 }
  0xd1   :  { %v153_v34 = vadd.f32 %v152_v28, %v52_v31  ;;  %v165_v45 = vmax.f32 %v151_v36, 0.0 }
  0xd2   :  { %v156_v30 = vpop.f32.mrf.mxu0 }
  0xd3   :  { %v157_v32 = vadd.f32 %v156_v30, %v57_v26  ;;  %v166_v43 = vmax.f32 %v153_v34, 0.0 }
  0xd4   :  { %v158_v33 = vpop.f32.mrf.mxu0 }
  0xd5   :  { %v159_v35 = vadd.f32 %v158_v33, %v57_v26  ;;  %v167_v41 = vmax.f32 %v157_v32, 0.0 }
  0xd7   :  { %v168_v39 = vmax.f32 %v159_v35, 0.0  ;;  %v363_v35 = vlaneseq }
  0xd9   :  { %234 = vmatprep.subr.mxu1 %v168_v39  ;;  %v364_v40 = vshrl.u32 %v363_v35, 7  ;;  %vm389_vm2 = vcmp.lt.s32.totalorder %v363_v35, 256 }
  0xda   :  { %235 = vmatpush1.msra.mxu1 %v167_v41 }
  0xdb   :  { %236 = vmatprep.subr.mxu1 %v166_v43 }
  0xdc   :  { %237 = vmatpush1.msra.mxu1 %v165_v45  ;;  %v444_v45 = vmov 1966171168  }
  0xdd   :  { %238 = vmatprep.subr.mxu1 %v164_v46  ;;  %v373_v46 = vunpack.c.l.s4 %v444_v45 }
  0xde   :  { %239 = vmatpush1.msra.mxu1 %v163_v47  ;;  %v365_v47 = vsub.s32 0, %v364_v40 }
  0xdf   :  { %240 = vmatprep.subr.mxu1 %v162_v48 }
  0xe0   :  { %241 = vmatpush1.msra.mxu1 %v161_v49 }
  0xe1   :  { %410 = vmatmul.mubr.msk.f32.vlgmr.msra.gmra.mxu1 %vm197_vm1, %v169_v50  ;;  %v361_v50 = vpop.permute.xlu0 %360 }
  0xe2   :  { %280 = vmatprep.mubr.f32.mxu1 %v442_v4 }
  0xe5   :  { %411 = vmatmul.mubr.msk.f32.gmra.mxu1 %vm197_vm1, %v170_v51 }
  0xe6   :  { %286 = vmatprep.mubr.f32.mxu1 %v442_v4 }
  0xe9   :  { %412 = vmatmul.mubr.msk.f32.gmra.mxu1 %vm197_vm1, %v171_v52 }
  0xea   :  { %292 = vmatprep.mubr.f32.mxu1 %v442_v4 }
  0xed   :  { %413 = vmatmul.mubr.msk.f32.gmra.mxu1 %vm197_vm1, %v172_v53  ;;  %v374_v53 = vunpack.c.0.s8 %v373_v46 }
 0x1a1   :  { %v276_v57 = vpop.f32.mrf.mxu1 }
 0x1a2   :  { %v277_v60 = vadd.f32 %v276_v57, %v180_v54 }
 0x1a3   :  { %v278_v58 = vpop.f32.mrf.mxu1 }
 0x1a4   :  { %v279_v0 = vadd.f32 %v278_v58, %v180_v54  ;;  %v299_v4 = vmax.f32 %v277_v60, 0.0  ;;  %v366_v54 = vrot.slane %v361_v50, %v365_v47  ;;  %v377_v58 = vsub.s32 %v374_v53, %v364_v40 }
 0x1a5   :  { %v282_v61 = vpop.f32.mrf.mxu1 }
 0x1a6   :  { %v283_v62 = vadd.f32 %v282_v61, %v185_v55  ;;  %v300_v9 = vmax.f32 %v279_v0, 0.0  ;;  %v331_v15 = vmul.f32 %v314_v63, %v299_v4 }
 0x1a7   :  { %v284_v1 = vpop.f32.mrf.mxu1 }
 0x1a8   :  { %v301_v2 = vmax.f32 %v283_v62, 0.0  ;;  %v285_v3 = vadd.f32 %v284_v1, %v185_v55  ;;  %v332_v21 = vmul.f32 %v314_v63, %v300_v9 }
 0x1a9   :  { %v288_v5 = vpop.f32.mrf.mxu1 }
 0x1aa   :  { %v302_v6 = vmax.f32 %v285_v3, 0.0  ;;  %v289_v7 = vadd.f32 %v288_v5, %v190_v56  ;;  %v333_v11 = vmul.f32 %v319_v8, %v301_v2 }
 0x1ab   :  { %v290_v10 = vpop.f32.mrf.mxu1 }
 0x1ac   :  { %v303_v12 = vmax.f32 %v289_v7, 0.0  ;;  %v291_v13 = vadd.f32 %v290_v10, %v190_v56  ;;  %v334_v17 = vmul.f32 %v319_v8, %v302_v6  ;;  %v339_v23 = vadd.f32 %v333_v11, %v331_v15 }
 0x1ad   :  { %v294_v16 = vpop.f32.mrf.mxu1 }
 0x1ae   :  { %v335_v18 = vmul.f32 %v324_v14, %v303_v12  ;;  %v304_v19 = vmax.f32 %v291_v13, 0.0  ;;  %v295_v20 = vadd.f32 %v294_v16, %v195_v59  ;;  %v348_v28 = vadd.f32 %v334_v17, %v332_v21 }
 0x1af   :  { %v296_v22 = vpop.f32.mrf.mxu1 }
 0x1b0   :  { %v336_v24 = vmul.f32 %v324_v14, %v304_v19  ;;  %v305_v25 = vmax.f32 %v295_v20, 0.0  ;;  %v297_v26 = vadd.f32 %v296_v22, %v195_v59  ;;  %v340_v29 = vadd.f32 %v339_v23, %v335_v18 }
 0x1b2   :  { %v337_v30 = vmul.f32 %v329_v27, %v305_v25  ;;  %v306_v31 = vmax.f32 %v297_v26, 0.0  ;;  %v349_v32 = vadd.f32 %v348_v28, %v336_v24 }
 0x1b4   :  { %v341_v33 = vadd.f32 %v340_v29, %v337_v30  ;;  %v338_v34 = vmul.f32 %v329_v27, %v306_v31 }
 0x1b6   :  { %v342_v36 = vrot.slane %v341_v33, 4  ;;  %v350_v37 = vadd.f32 %v349_v32, %v338_v34 }
 0x1b8   :  { %v343_v38 = vadd.f32 %v342_v36, %v341_v33  ;;  %v351_v39 = vrot.slane %v350_v37, 4 }
 0x1ba   :  { %v344_v41 = vrot.slane %v343_v38, 2  ;;  %v352_v42 = vadd.f32 %v351_v39, %v350_v37 }
 0x1bc   :  { %v345_v43 = vadd.f32 %v344_v41, %v343_v38  ;;  %v353_v44 = vrot.slane %v352_v42, 2 }
 0x1be   :  { %v346_v48 = vrot.slane %v345_v43, 1  ;;  %v354_v49 = vadd.f32 %v353_v44, %v352_v42 }
 0x1c0   :  { %v347_v51 = vadd.f32 %v346_v48, %v345_v43  ;;  %v355_v52 = vrot.slane %v354_v49, 1 }
 0x1c2   :  { %v356_v55 = vadd.f32 %v355_v52, %v354_v49  ;;  %v367_v56 = vadd.f32 %v366_v54, %v347_v51 }
 0x1c4   :  { %v368_v57 = vadd.f32 %v366_v54, %v356_v55 }
 0x1c6   :  { %v371_v59 = vcombine.low %v367_v56, %v368_v57 }
 0x1c8   :  { %v378_v60 = vrot.slane %v371_v59, %v377_v58 }
 0x1ca   :  { %v385_v61 = vrot.slane %v378_v60, %v377_v58 }
 0x1cc   :  { %391 = vst.msk [vmem:[#allocation3] sm:$0x3] %vm389_vm2, %v385_v61 }
 0x1cd   :  { %431 = shalt.err (!%p428_p4)
}
 0x1ce   :  { %401 = dma.vmem_to_hbm [thread:$0]  %s399_s16, 32, %s577_s7, [#allocation4]  }
 0x1cf   :  { %440 = dma.done.wait [#allocation4], 32  }
 0x1d0   :  { %441 = vsyncadd [#allocation4], 4294967264 }
 0x1d1   :  { %405 = vsyncpa [#allocation4], 1 }

</bundles_post_ra>
